<compile_context>
chip_gen: v7x
topology: tpu7x:2x2x1
jax: 0.10.0
libtpu: 0.0.40
codegen_flags: <defaults>
</compile_context>

<pallas_src>
import functools

import jax
import jax.numpy as jnp
from jax import lax
from jax.experimental import pallas as pl
from jax.experimental.pallas import tpu as pltpu


def _round_up(x: int, m: int) -> int:
    return ((x + m - 1) // m) * m


def _pick_tb(batch, row_bytes, *, itemsize, budget_bytes=12 * 2**20,
             max_tb=512, min_steps=8):
    """Batch-tile rows per grid step, sized from a (double-buffered) VMEM budget."""
    align = 16 if itemsize < 4 else 8            # respect bf16 sublane packing
    by_budget = (budget_bytes // max(row_bytes, 1)) // align * align
    tb = max(align, min(max_tb, by_budget))
    # Keep >= min_steps grid steps when the batch is large enough: gives the
    # software pipeline room to hide the writeback DMA and lets v7x's two
    # TensorCores split the ("parallel") batch axis.
    tb = min(tb, max(align, _round_up(pl.cdiv(batch, min_steps), align)))
    return int(tb)


def _vmem_limit(row_bytes, tb):
    # row_bytes already includes double buffering; add compiler-scratch headroom.
    return int(min(48 * 2**20, max(20 * 2**20, row_bytes * tb + 8 * 2**20)))


# ----------------------------------------------------------------------------
# Preferred kernel: lane-dense flat output, contiguous 2-D inputs.
# ----------------------------------------------------------------------------
def _build_flat_impl(batch, d1, dtype):
    feat = d1 * d1
    itemsize = jnp.dtype(dtype).itemsize
    # double-buffered VMEM bytes per batch row (lane-padded to 128)
    row_bytes = 2 * (_round_up(feat, 128) + 2 * _round_up(d1, 128)) * itemsize
    tb = _pick_tb(batch, row_bytes, itemsize=itemsize)
    ch = min(16 if itemsize < 4 else 8, tb)      # rows per in-kernel chunk

    def kernel(th_ref, ih_ref, out_ref):
        # th_ref / ih_ref: (tb, d1);  out_ref: (tb, d1*d1)
        def body(c, carry):
            r0 = pl.multiple_of(c * ch, ch)
            a = th_ref[pl.ds(r0, ch), :]                    # (ch, d1)
            b = ih_ref[pl.ds(r0, ch), :]                    # (ch, d1)
            prod = a[:, :, None] * b[:, None, :]            # (ch, d1, d1)  (VPU)
            out_ref[pl.ds(r0, ch), :] = (
                prod.reshape(ch, feat).astype(out_ref.dtype))
            return carry
        lax.fori_loop(0, tb // ch, body, 0)

    cost = pl.CostEstimate(
        flops=batch * feat,
        transcendentals=0,
        bytes_accessed=batch * (2 * d1 + feat) * itemsize,
    )

    call = pl.pallas_call(
        kernel,
        out_shape=jax.ShapeDtypeStruct((batch, feat), dtype),
        grid_spec=pltpu.PrefetchScalarGridSpec(
            num_scalar_prefetch=0,
            grid=(pl.cdiv(batch, tb),),                     # partial last block masked
            in_specs=[pl.BlockSpec((tb, d1), lambda i: (i, 0)),
                      pl.BlockSpec((tb, d1), lambda i: (i, 0))],
            out_specs=pl.BlockSpec((tb, feat), lambda i: (i, 0)),
        ),
        compiler_params=pltpu.CompilerParams(
            dimension_semantics=("parallel",),
            vmem_limit_bytes=_vmem_limit(row_bytes, tb),
        ),
        cost_estimate=cost,
    )

    def impl(text_h, image_h):
        return call(text_h, image_h)

    return impl


# ----------------------------------------------------------------------------
# Fallback kernel (always lowers): 3-D broadcast outer product.
# ----------------------------------------------------------------------------
def _build_outer3d_impl(batch, d1, dtype):
    # TODO(synk): fallback writeback is lane-sparse (d1 of 128 lanes) and the
    # (d1,1)-shaped text operand DMAs as 4-byte rows; only used when Mosaic
    # rejects the in-kernel rank-expansion/flatten of the preferred kernel.
    feat = d1 * d1
    itemsize = jnp.dtype(dtype).itemsize
    sub = _round_up(d1, 16 if itemsize < 4 else 8)
    # double-buffered padded VMEM bytes per batch row: out slab + th slab + ih row
    row_bytes = 2 * (sub * 128 + sub * 128 + 8 * 128) * itemsize
    tb = _pick_tb(batch, row_bytes, itemsize=itemsize)
    ch = min(16 if itemsize < 4 else 8, tb)

    def kernel(th_ref, ih_ref, out_ref):
        # th_ref: (tb, d1, 1); ih_ref: (tb, 1, d1); out_ref: (tb, d1, d1)
        def body(c, carry):
            sl = pl.ds(pl.multiple_of(c * ch, ch), ch)
            out_ref[sl] = (th_ref[sl] * ih_ref[sl]).astype(out_ref.dtype)
            return carry
        lax.fori_loop(0, tb // ch, body, 0)

    cost = pl.CostEstimate(
        flops=batch * feat,
        transcendentals=0,
        bytes_accessed=batch * (2 * d1 + feat) * itemsize,
    )

    call = pl.pallas_call(
        kernel,
        out_shape=jax.ShapeDtypeStruct((batch, d1, d1), dtype),
        grid_spec=pltpu.PrefetchScalarGridSpec(
            num_scalar_prefetch=0,
            grid=(pl.cdiv(batch, tb),),
            in_specs=[pl.BlockSpec((tb, d1, 1), lambda i: (i, 0, 0)),
                      pl.BlockSpec((tb, 1, d1), lambda i: (i, 0, 0))],
            out_specs=pl.BlockSpec((tb, d1, d1), lambda i: (i, 0, 0)),
        ),
        compiler_params=pltpu.CompilerParams(
            dimension_semantics=("parallel",),
            vmem_limit_bytes=_vmem_limit(row_bytes, tb),
        ),
        cost_estimate=cost,
    )

    def impl(text_h, image_h):
        b = text_h.shape[0]
        out3 = call(text_h.reshape(b, d1, 1), image_h.reshape(b, 1, d1))
        # row-major (b, d1, d1) has the same bytes as (b, d1*d1): free reshape.
        return out3.reshape(b, feat)

    return impl


@functools.lru_cache(maxsize=None)
def _get_impl(batch, d1, dtype_name):
    dtype = jnp.dtype(dtype_name)
    try:
        impl = _build_flat_impl(batch, d1, dtype)
        arg = jax.ShapeDtypeStruct((batch, d1), dtype)
        jax.jit(impl).lower(arg, arg).compile()   # probe: does Mosaic lower it?
        return impl
    except Exception:
        return _build_outer3d_impl(batch, d1, dtype)


def tensor_fusion(t, v):
    """Pallas equivalent of tensorFusion.forward: (B, D) x (B, D) -> (B, (D+1)**2)."""
    assert t.ndim == 2 and t.shape == v.shape and t.dtype == v.dtype
    batch, d = t.shape
    d1 = d + 1
    add_one = jnp.ones((batch, 1), dtype=t.dtype)
    text_h = jnp.concatenate([add_one, t], axis=1)     # (B, D+1)
    image_h = jnp.concatenate([add_one, v], axis=1)    # (B, D+1)
    impl = _get_impl(batch, d1, jnp.dtype(t.dtype).name)
    return impl(text_h, image_h)


def tensor_fusion_reference(t, v):
    """Pure-JAX reference of the PyTorch forward, for correctness checking."""
    b, d = t.shape
    d1 = d + 1
    add_one = jnp.ones((b, 1), dtype=t.dtype)
    text_h = jnp.concatenate([add_one, t], axis=1)
    image_h = jnp.concatenate([add_one, v], axis=1)
    fusion = text_h[:, :, None] * image_h[:, None, :]
    return fusion.reshape(b, d1 * d1)


if __name__ == "__main__":
    # args.embd_size = 32 (synthetic); batch = 2.
    B, D = 2, 32
    key = jax.random.PRNGKey(0)
    k_t, k_v = jax.random.split(key)
    t = jax.random.normal(k_t, (B, D), dtype=jnp.float32)
    v = jax.random.normal(k_v, (B, D), dtype=jnp.float32)

    out = jax.block_until_ready(tensor_fusion(t, v))
    ref = tensor_fusion_reference(t, v)
    assert out.shape == (B, (D + 1) ** 2), out.shape
    assert jnp.allclose(out, ref, atol=1e-5, rtol=1e-5), "mismatch vs reference"

    # Second check: batch that does not divide the tile (masked partial block).
    B2 = 5
    t2 = jax.random.normal(k_t, (B2, D), dtype=jnp.float32)
    v2 = jax.random.normal(k_v, (B2, D), dtype=jnp.float32)
    out2 = jax.block_until_ready(tensor_fusion(t2, v2))
    assert jnp.allclose(out2, tensor_fusion_reference(t2, v2),
                        atol=1e-5, rtol=1e-5), "mismatch vs reference (partial block)"

    print("KERNEL_OK")
</pallas_src>

<mosaic_0001>
module attributes {stable_mosaic.version = 11 : i64} {
  func.func @kernel(%arg0: i32, %arg1: memref<8x33x1xf32, #tpu.memory_space<vmem>>, %arg2: memref<8x1x33xf32, #tpu.memory_space<vmem>>, %arg3: memref<8x33x33xf32, #tpu.memory_space<vmem>>) attributes {dimension_semantics = [#tpu.dimension_semantics<parallel>], iteration_bounds = array<i64: 1>, scalar_prefetch = 0 : i64, scratch_operands = 0 : i64, tpu.core_type = #tpu.core_type<tc>, window_params = [{transform_indices = @transform_0, window_bounds = array<i64: 8, 33, 1>}, {transform_indices = @transform_1, window_bounds = array<i64: 8, 1, 33>}, {transform_indices = @transform_2, window_bounds = array<i64: 8, 33, 33>}]} {
    %c0_i32 = arith.constant 0 : i32
    %c8_i32 = arith.constant 8 : i32
    %0 = arith.muli %c0_i32, %c8_i32 : i32
    %1 = tpu.assume_multiple %0, 8 : i32
    %2 = arith.index_cast %1 : i32 to index
    %c0 = arith.constant 0 : index
    %c0_0 = arith.constant 0 : index
    %3 = vector.load %arg1[%2, %c0, %c0_0] : memref<8x33x1xf32, #tpu.memory_space<vmem>>, vector<8x33x1xf32>
    %4 = arith.index_cast %1 : i32 to index
    %c0_1 = arith.constant 0 : index
    %c0_2 = arith.constant 0 : index
    %5 = vector.load %arg2[%4, %c0_1, %c0_2] : memref<8x1x33xf32, #tpu.memory_space<vmem>>, vector<8x1x33xf32>
    %6 = vector.broadcast %3 : vector<8x33x1xf32> to vector<8x33x33xf32>
    %7 = vector.broadcast %5 : vector<8x1x33xf32> to vector<8x33x33xf32>
    %8 = arith.mulf %6, %7 : vector<8x33x33xf32>
    %9 = arith.index_cast %1 : i32 to index
    %c0_3 = arith.constant 0 : index
    %c0_4 = arith.constant 0 : index
    %10 = vector.load %arg3[%9, %c0_3, %c0_4] : memref<8x33x33xf32, #tpu.memory_space<vmem>>, vector<8x33x33xf32>
    tpu.vector_store %arg3[%9, %c0_3, %c0_4], %8 {strides = array<i32>} : memref<8x33x33xf32, #tpu.memory_space<vmem>>, vector<8x33x33xf32>,
    %c1_i32 = arith.constant 1 : i32
    return
  }
  func.func @transform_0(%arg0: i32) -> (i32, i32, i32) {
    %c0_i32 = arith.constant 0 : i32
    %c0_i32_0 = arith.constant 0 : i32
    %c0_i32_1 = arith.constant 0 : i32
    return %arg0, %c0_i32, %c0_i32_0 : i32, i32, i32
  }
  func.func @transform_1(%arg0: i32) -> (i32, i32, i32) {
    %c0_i32 = arith.constant 0 : i32
    %c0_i32_0 = arith.constant 0 : i32
    %c0_i32_1 = arith.constant 0 : i32
    return %arg0, %c0_i32, %c0_i32_0 : i32, i32, i32
  }
  func.func @transform_2(%arg0: i32) -> (i32, i32, i32) {
    %c0_i32 = arith.constant 0 : i32
    %c0_i32_0 = arith.constant 0 : i32
    %c0_i32_1 = arith.constant 0 : i32
    return %arg0, %c0_i32, %c0_i32_0 : i32, i32, i32
  }
}

</mosaic_0001>

<bundles_post_ra>
// kernel: tpu_custom_call.1
= control target key start
LH: loop header
LB: loop body
LE: loop exit
PB: predicated region body
PF: predicated region fallthrough
CT: control target
= control target key end

     0   :  { %v479_v2 = vmov 0   ;;  %vm350_vm0 = vcmask 269312   ;;  %vm355_vm1 = vcmask 262144   ;;  %s661_s0 = inlined_call_operand.vmem [shape: f32[2,33,1], index: 0, kind: input, shape index: {}]   ;;  %s662_s1 = inlined_call_operand.vmem [shape: f32[2,1,33], index: 1, kind: input, shape index: {}]   ;;  %s663_s2 = inlined_call_operand.vmem [shape: f32[2,33,33], index: 2, kind: output, shape index: {}]  }
   0x1   :  { %v15_v0 = vld [vmem:[%s661_s0 + $0x10] sm:$0xff]  ;;  %v13_v1 = vld [vmem:[%s661_s0] sm:$0xff]  ;;  %478 = vset.pattern.permute.xlu1 %v479_v2  ;;  %477 = vset.pattern.permute.xlu0 %v479_v2  ;;  %v16_v3 = vld [vmem:[%s661_s0 + $0x18] sm:$0xff] }
   0x2   :  { %73 = vperm.xlu1 %478, %v15_v0   ;;  %63 = vperm.xlu0 %477, %v13_v1   ;;  %v14_v4 = vld [vmem:[%s661_s0 + $0x8] sm:$0xff]  ;;  %v17_v6 = vld [vmem:[%s661_s0 + $0x20] sm:$0x1]  ;;  %v20_v7 = vld [vmem:[%s661_s0 + $0x38] sm:$0xff] }
   0x3   :  { %v18_v5 = vld [vmem:[%s661_s0 + $0x28] sm:$0xff]  ;;  %v19_v8 = vld [vmem:[%s661_s0 + $0x30] sm:$0xff]  ;;  %v21_v10 = vld [vmem:[%s661_s0 + $0x40] sm:$0xff] }
   0x4   :  { %v22_v9 = vld [vmem:[%s661_s0 + $0x48] sm:$0x1]  ;;  %v24_v11 = vld [vmem:[%s661_s0 + $0x58] sm:$0xff]  ;;  %v23_v12 = vld [vmem:[%s661_s0 + $0x50] sm:$0xff] }
   0x5   :  { %v26_v13 = vld [vmem:[%s661_s0 + $0x68] sm:$0xff]  ;;  %v25_v14 = vld [vmem:[%s661_s0 + $0x60] sm:$0xff]  ;;  %v28_v15 = vld [vmem:[%s661_s0 + $0x78] sm:$0xff] }
   0x6   :  { %78 = vperm.xlu1 %478, %v16_v3   ;;  %68 = vperm.xlu0 %477, %v14_v4   ;;  %v27_v16 = vld [vmem:[%s661_s0 + $0x70] sm:$0x1]  ;;  %v30_v17 = vld [vmem:[%s661_s0 + $0x88] sm:$0xff]  ;;  %v29_v18 = vld [vmem:[%s661_s0 + $0x80] sm:$0xff] }
   0x7   :  { %v32_v19 = vld [vmem:[%s661_s0 + $0x98] sm:$0x1]  ;;  %v31_v20 = vld [vmem:[%s661_s0 + $0x90] sm:$0xff]  ;;  %v34_v21 = vld [vmem:[%s661_s0 + $0xa8] sm:$0xff] }
   0x8   :  { %v33_v22 = vld [vmem:[%s661_s0 + $0xa0] sm:$0xff]  ;;  %v36_v23 = vld [vmem:[%s661_s0 + $0xb8] sm:$0xff]  ;;  %v35_v24 = vld [vmem:[%s661_s0 + $0xb0] sm:$0xff] }
   0x9   :  { %v38_v25 = vld [vmem:[%s661_s0 + $0xc8] sm:$0xff]  ;;  %v37_v26 = vld [vmem:[%s661_s0 + $0xc0] sm:$0x1]  ;;  %v40_v27 = vld [vmem:[%s661_s0 + $0xd8] sm:$0xff] }
   0xa   :  { %88 = vperm.xlu1 %478, %v18_v5   ;;  %83 = vperm.xlu0 %477, %v17_v6   ;;  %v39_v28 = vld [vmem:[%s661_s0 + $0xd0] sm:$0xff]  ;;  %v42_v29 = vld [vmem:[%s661_s0 + $0xe8] sm:$0x1]  ;;  %v41_v30 = vld [vmem:[%s661_s0 + $0xe0] sm:$0xff] }
   0xb   :  { %v44_v31 = vld [vmem:[%s661_s0 + $0xf8] sm:$0xff]  ;;  %v43_v32 = vld [vmem:[%s661_s0 + $0xf0] sm:$0xff]  ;;  %v46_v33 = vld [vmem:[%s661_s0 + $0x108] sm:$0xff] }
   0xc   :  { %v45_v34 = vld [vmem:[%s661_s0 + $0x100] sm:$0xff]  ;;  %v48_v35 = vld [vmem:[%s661_s0 + $0x118] sm:$0xff]  ;;  %v47_v36 = vld [vmem:[%s661_s0 + $0x110] sm:$0x1] }
   0xd   :  { %v50_v37 = vld [vmem:[%s661_s0 + $0x128] sm:$0xff]  ;;  %v49_v38 = vld [vmem:[%s661_s0 + $0x120] sm:$0xff]  ;;  %v52_v39 = vld [vmem:[%s661_s0 + $0x138] sm:$0x1] }
   0xe   :  { %98 = vperm.xlu1 %478, %v20_v7   ;;  %93 = vperm.xlu0 %477, %v19_v8   ;;  %v51_v40 = vld [vmem:[%s661_s0 + $0x130] sm:$0xff]  ;;  %v468_v41 = vld [vmem:[%s662_s1] ss:$0 sm:$0xff]  ;;  %v469_v50 = vld [vmem:[%s662_s1 + $0x1] ss:$0 sm:$0xff] }
  0x12   :  { %108 = vperm.xlu1 %478, %v22_v9   ;;  %103 = vperm.xlu0 %477, %v21_v10  }
  0x16   :  { %118 = vperm.xlu1 %478, %v24_v11   ;;  %113 = vperm.xlu0 %477, %v23_v12  }
  0x1a   :  { %128 = vperm.xlu1 %478, %v26_v13   ;;  %123 = vperm.xlu0 %477, %v25_v14  }
  0x1e   :  { %138 = vperm.xlu1 %478, %v28_v15   ;;  %133 = vperm.xlu0 %477, %v27_v16  }
  0x22   :  { %148 = vperm.xlu1 %478, %v30_v17   ;;  %143 = vperm.xlu0 %477, %v29_v18  }
  0x26   :  { %158 = vperm.xlu1 %478, %v32_v19   ;;  %153 = vperm.xlu0 %477, %v31_v20  }
  0x2a   :  { %168 = vperm.xlu1 %478, %v34_v21   ;;  %163 = vperm.xlu0 %477, %v33_v22  }
  0x2e   :  { %178 = vperm.xlu1 %478, %v36_v23   ;;  %173 = vperm.xlu0 %477, %v35_v24  }
  0x32   :  { %188 = vperm.xlu1 %478, %v38_v25   ;;  %183 = vperm.xlu0 %477, %v37_v26  }
  0x36   :  { %198 = vperm.xlu1 %478, %v40_v27   ;;  %193 = vperm.xlu0 %477, %v39_v28  }
  0x3a   :  { %208 = vperm.xlu1 %478, %v42_v29   ;;  %203 = vperm.xlu0 %477, %v41_v30  }
  0x3e   :  { %218 = vperm.xlu1 %478, %v44_v31   ;;  %213 = vperm.xlu0 %477, %v43_v32  }
  0x42   :  { %228 = vperm.xlu1 %478, %v46_v33   ;;  %223 = vperm.xlu0 %477, %v45_v34  }
  0x46   :  { %238 = vperm.xlu1 %478, %v48_v35   ;;  %233 = vperm.xlu0 %477, %v47_v36  }
  0x4a   :  { %248 = vperm.xlu1 %478, %v50_v37   ;;  %243 = vperm.xlu0 %477, %v49_v38  }
  0x4e   :  { %258 = vperm.xlu1 %478, %v52_v39   ;;  %253 = vperm.xlu0 %477, %v51_v40  }
  0x81   :  { %v74_v42 = vpop.permute.xlu1 %73  ;;  %v64_v43 = vpop.permute.xlu0 %63 }
  0x82   :  { %v311_v44 = vmul.f32 %v468_v41, %v74_v42  ;;  %v309_v45 = vmul.f32 %v468_v41, %v64_v43 }
  0x84   :  { %353 = vst.msk [vmem:[#allocation2 + $0x10] sm:$0xff] %vm350_vm0, %v311_v44  ;;  %351 = vst.msk [vmem:[#allocation2] sm:$0xff] %vm350_vm0, %v309_v45 }
  0x85   :  { %v79_v46 = vpop.permute.xlu1 %78  ;;  %v69_v47 = vpop.permute.xlu0 %68 }
  0x86   :  { %v312_v48 = vmul.f32 %v468_v41, %v79_v46  ;;  %v310_v49 = vmul.f32 %v468_v41, %v69_v47 }
  0x88   :  { %354 = vst.msk [vmem:[#allocation2 + $0x18] sm:$0xff] %vm350_vm0, %v312_v48  ;;  %352 = vst.msk [vmem:[#allocation2 + $0x8] sm:$0xff] %vm350_vm0, %v310_v49 }
  0x89   :  { %v89_v51 = vpop.permute.xlu1 %88  ;;  %v84_v52 = vpop.permute.xlu0 %83 }
  0x8a   :  { %v314_v53 = vmul.f32 %v469_v50, %v89_v51  ;;  %v313_v54 = vmul.f32 %v468_v41, %v84_v52 }
  0x8b   :  { %v443_v55 = vld [vmem:[#allocation2 + $0x10] sm:$0xff]  ;;  %v439_v56 = vld [vmem:[#allocation2] sm:$0xff] }
  0x8c   :  { %444 = vst [vmem:[%s663_s2 + $0x10] sm:$0xff] %v443_v55  ;;  %440 = vst [vmem:[%s663_s2] sm:$0xff] %v439_v56 }
  0x8d   :  { %357 = vst.msk [vmem:[#allocation2 + $0x28] sm:$0xff] %vm350_vm0, %v314_v53  ;;  %v99_v57 = vpop.permute.xlu1 %98  ;;  %v94_v58 = vpop.permute.xlu0 %93 }
  0x8e   :  { %356 = vst.msk [vmem:[#allocation2 + $0x20] sm:$0x1] %vm355_vm1, %v313_v54  ;;  %v316_v59 = vmul.f32 %v469_v50, %v99_v57  ;;  %v315_v60 = vmul.f32 %v469_v50, %v94_v58 }
  0x8f   :  { %v445_v61 = vld [vmem:[#allocation2 + $0x18] sm:$0xff]  ;;  %v441_v62 = vld [vmem:[#allocation2 + $0x8] sm:$0xff] }
  0x90   :  { %446 = vst [vmem:[%s663_s2 + $0x18] sm:$0xff] %v445_v61  ;;  %442 = vst [vmem:[%s663_s2 + $0x8] sm:$0xff] %v441_v62 }
  0x91   :  { %359 = vst.msk [vmem:[#allocation2 + $0x38] sm:$0xff] %vm350_vm0, %v316_v59  ;;  %358 = vst.msk [vmem:[#allocation2 + $0x30] sm:$0xff] %vm350_vm0, %v315_v60  ;;  %v109_v63 = vpop.permute.xlu1 %108  ;;  %v104_v0 = vpop.permute.xlu0 %103 }
  0x92   :  { %v318_v1 = vmul.f32 %v469_v50, %v109_v63  ;;  %v317_v2 = vmul.f32 %v469_v50, %v104_v0 }
  0x94   :  { %v449_v3 = vld [vmem:[#allocation2 + $0x28] sm:$0xff]  ;;  %361 = vst.msk [vmem:[#allocation2 + $0x48] sm:$0x1] %vm355_vm1, %v318_v1 }
  0x95   :  { %v447_v4 = vld [vmem:[#allocation2 + $0x20] sm:$0xff]  ;;  %450 = vst [vmem:[%s663_s2 + $0x28] sm:$0xff] %v449_v3  ;;  %360 = vst.msk [vmem:[#allocation2 + $0x40] sm:$0xff] %vm350_vm0, %v317_v2  ;;  %v119_v5 = vpop.permute.xlu1 %118  ;;  %v114_v6 = vpop.permute.xlu0 %113 }
  0x96   :  { %448 = vst [vmem:[%s663_s2 + $0x20] sm:$0xff] %v447_v4 }
  0x98   :  { %v453_v7 = vld [vmem:[#allocation2 + $0x38] sm:$0xff]  ;;  %v451_v8 = vld [vmem:[#allocation2 + $0x30] sm:$0xff] }
  0x99   :  { %454 = vst [vmem:[%s663_s2 + $0x38] sm:$0xff] %v453_v7  ;;  %452 = vst [vmem:[%s663_s2 + $0x30] sm:$0xff] %v451_v8  ;;  %v129_v9 = vpop.permute.xlu1 %128  ;;  %v124_v10 = vpop.permute.xlu0 %123 }
  0x9b   :  { %v457_v11 = vld [vmem:[#allocation2 + $0x48] sm:$0xff] }
  0x9c   :  { %v455_v12 = vld [vmem:[#allocation2 + $0x40] sm:$0xff]  ;;  %458 = vst [vmem:[%s663_s2 + $0x48] sm:$0xff] %v457_v11 }
  0x9d   :  { %456 = vst [vmem:[%s663_s2 + $0x40] sm:$0xff] %v455_v12  ;;  %v139_v13 = vpop.permute.xlu1 %138  ;;  %v134_v14 = vpop.permute.xlu0 %133 }
  0xa1   :  { %v149_v15 = vpop.permute.xlu1 %148  ;;  %v144_v16 = vpop.permute.xlu0 %143 }
  0xa5   :  { %v159_v17 = vpop.permute.xlu1 %158  ;;  %v154_v18 = vpop.permute.xlu0 %153 }
  0xa9   :  { %v169_v19 = vpop.permute.xlu1 %168  ;;  %v164_v20 = vpop.permute.xlu0 %163 }
  0xad   :  { %v179_v21 = vpop.permute.xlu1 %178  ;;  %v174_v22 = vpop.permute.xlu0 %173 }
  0xb1   :  { %v189_v23 = vpop.permute.xlu1 %188  ;;  %v184_v24 = vpop.permute.xlu0 %183 }
  0xb5   :  { %v199_v25 = vpop.permute.xlu1 %198  ;;  %v194_v26 = vpop.permute.xlu0 %193 }
  0xb9   :  { %v209_v27 = vpop.permute.xlu1 %208  ;;  %v204_v28 = vpop.permute.xlu0 %203 }
  0xbd   :  { %v219_v29 = vpop.permute.xlu1 %218  ;;  %v214_v30 = vpop.permute.xlu0 %213 }
  0xc1   :  { %v229_v31 = vpop.permute.xlu1 %228  ;;  %v224_v32 = vpop.permute.xlu0 %223 }
  0xc5   :  { %v239_v33 = vpop.permute.xlu1 %238  ;;  %v234_v34 = vpop.permute.xlu0 %233 }
  0xc9   :  { %v249_v35 = vpop.permute.xlu1 %248  ;;  %v244_v36 = vpop.permute.xlu0 %243 }
  0xcd   :  { %v259_v37 = vpop.permute.xlu1 %258  ;;  %v254_v38 = vpop.permute.xlu0 %253 }

</bundles_post_ra>
